<compile_context>
chip_gen: v7x
topology: tpu7x:2x2x1
jax: 0.10.0
libtpu: 0.0.40
codegen_flags: <defaults>
</compile_context>

<pallas_src>
import jax
import jax.numpy as jnp
from jax.experimental import pallas as pl
from jax.experimental.pallas import tpu as pltpu

_LANE = 128                     # lanes per vreg row
_MIN_TB_2X2 = 256               # batch elems per block must be a multiple of 256
                                # (=> block rows = TB/32 is a multiple of 8)
_MAX_TB_2X2 = 65536             # 1 MiB per ref per block; ~8 MiB pipeline VMEM
_JNP_FASTPATH_ELEMS = 16384     # per-input elements below which XLA fusion wins
_VMEM_LIMIT = 32 * 1024 * 1024  # safe on v5e/v6e (128 MiB) and v7x (64 MiB) VMEM


def _round_up(x, m):
    return ((x + m - 1) // m) * m


def _roll_lanes(x, shift):
    # Cyclic rotation along the lane (minor) axis; always use a positive shift.
    return pltpu.roll(x, shift % _LANE, axis=1)


# --------------------------------------------------------------------------
# D == 2: VPU-only kernel on the natural interleaved layout.
# Each ref is a (TR, 128) tile of the flat row-major (B*4,) data: every group
# of 4 consecutive lanes is one batch element's 2x2 matrix in row-major order
# (lane%4 == j, j = 2*r + c).
# --------------------------------------------------------------------------
def _tiny_2x2_kernel(x1_ref, x2_ref, x3_ref, o_ref):
    a = x1_ref[...].astype(jnp.float32)
    b = x2_ref[...].astype(jnp.float32)
    c = x3_ref[...].astype(jnp.float32)

    j = jax.lax.broadcasted_iota(jnp.int32, a.shape, 1) % 4
    is_col0 = (j & 1) == 0      # entry is (r, 0)
    is_row0 = j < 2             # entry is (0, c)

    def row_pair(m):
        # m_r0[l] = m[r, 0] of this element; m_r1[l] = m[r, 1].
        m_r0 = jnp.where(is_col0, m, _roll_lanes(m, 1))      # lane l-1 when c==1
        m_r1 = jnp.where(is_col0, _roll_lanes(m, -1), m)     # lane l+1 when c==0
        return m_r0, m_r1

    def col_pair(m):
        # m_0c[l] = m[0, c] of this element; m_1c[l] = m[1, c].
        m_0c = jnp.where(is_row0, m, _roll_lanes(m, 2))      # lane l-2 when r==1
        m_1c = jnp.where(is_row0, _roll_lanes(m, -2), m)     # lane l+2 when r==0
        return m_0c, m_1c

    # t = x1 @ x2 :  t[r,c] = a[r,0]*b[0,c] + a[r,1]*b[1,c]
    a_r0, a_r1 = row_pair(a)
    b_0c, b_1c = col_pair(b)
    t = a_r0 * b_0c + a_r1 * b_1c

    # u = x3 @ t :  u[r,c] = c[r,0]*t[0,c] + c[r,1]*t[1,c]
    c_r0, c_r1 = row_pair(c)
    t_0c, t_1c = col_pair(t)
    u = c_r0 * t_0c + c_r1 * t_1c

    # out = u^T : swap entries j==1 and j==2 inside each group of 4 lanes.
    out = jnp.where(j == 1, _roll_lanes(u, -1),
                    jnp.where(j == 2, _roll_lanes(u, 1), u))
    o_ref[...] = out.astype(o_ref.dtype)


def _pallas_2x2(x1, x2, x3):
    B = x1.shape[0]
    dtype = x1.dtype

    TB = min(_MAX_TB_2X2, _round_up(B, _MIN_TB_2X2))   # matrices per grid step
    B_pad = _round_up(B, TB)
    TR = TB // 32                                      # rows of 128 lanes / step

    def as_lane_slab(x):
        # (B, 2, 2) -> (B*4,) -> (B_pad/32, 128): free row-major reshapes,
        # only the (rare) zero-pad makes a copy.  Padded lanes compute on
        # zeros (no division anywhere) and are sliced off below.
        f = x.reshape(B * 4)
        if B_pad != B:
            f = jnp.pad(f, (0, (B_pad - B) * 4))
        return f.reshape(B_pad // 32, _LANE)

    spec = pl.BlockSpec((TR, _LANE), lambda i: (i, 0))
    out = pl.pallas_call(
        _tiny_2x2_kernel,
        out_shape=jax.ShapeDtypeStruct((B_pad // 32, _LANE), dtype),
        grid_spec=pltpu.PrefetchScalarGridSpec(
            num_scalar_prefetch=0,
            grid=(B_pad // TB,),
            in_specs=[spec, spec, spec],
            out_specs=spec,
        ),
        compiler_params=pltpu.CompilerParams(
            dimension_semantics=("parallel",),
            vmem_limit_bytes=_VMEM_LIMIT),
    )(as_lane_slab(x1), as_lane_slab(x2), as_lane_slab(x3))

    flat = out.reshape(B_pad * 4)
    if B_pad != B:
        flat = flat[: B * 4]
    return flat.reshape(B, 2, 2)


# --------------------------------------------------------------------------
# General D: batched MXU path, Bt matrices per grid step.  Both transposes
# are folded into dot_general dimension numbers.
# --------------------------------------------------------------------------
def _general_kernel(x1_ref, x2_ref, x3_ref, o_ref):
    a = x1_ref[...]     # (Bt, D, D)
    b = x2_ref[...]
    c = x3_ref[...]
    # t = x1 @ x2  (batched)
    t = jax.lax.dot_general(a, b, (((2,), (1,)), ((0,), (0,))),
                            preferred_element_type=jnp.float32)
    # out[b,k,i] = sum_j c[b,i,j] * t[b,j,k]  ==  ((x3 @ t)^T)[b,k,i]
    out = jax.lax.dot_general(t.astype(c.dtype), c, (((1,), (2,)), ((0,), (0,))),
                              preferred_element_type=jnp.float32)
    o_ref[...] = out.astype(o_ref.dtype)


def _pallas_general(x1, x2, x3):
    B, D, _ = x1.shape
    itemsize = jnp.dtype(x1.dtype).itemsize
    # ~1 MiB per input block; x4 refs x2 buffers + f32 intermediates stays
    # well inside the 32 MiB scoped-VMEM budget on all chips.
    # TODO(synk): for very large D (>~1024 f32) replace whole-matrix-per-step
    # with a K/N-tiled accumulator design (v7x has only 64 MiB VMEM per TC).
    Bt = max(1, min(B, (1 << 20) // max(1, D * D * itemsize)))
    B_pad = _round_up(B, Bt)

    def pad_b(x):
        return jnp.pad(x, ((0, B_pad - B), (0, 0), (0, 0))) if B_pad != B else x

    spec = pl.BlockSpec((Bt, D, D), lambda i: (i, 0, 0))
    out = pl.pallas_call(
        _general_kernel,
        out_shape=jax.ShapeDtypeStruct((B_pad, D, D), x1.dtype),
        grid_spec=pltpu.PrefetchScalarGridSpec(
            num_scalar_prefetch=0,
            grid=(B_pad // Bt,),
            in_specs=[spec, spec, spec],
            out_specs=spec,
        ),
        compiler_params=pltpu.CompilerParams(
            dimension_semantics=("parallel",),
            vmem_limit_bytes=_VMEM_LIMIT),
    )(pad_b(x1), pad_b(x2), pad_b(x3))
    return out[:B] if B_pad != B else out


def permute_matmul_fusion(x1, x2, x3, *, force_pallas=False):
    B, D, D2 = x1.shape
    assert D == D2 and x1.shape == x2.shape == x3.shape

    if not force_pallas and B * D * D <= _JNP_FASTPATH_ELEMS:
        # Tiny problem (incl. the module's real (1,2,2) shape): a pallas_call
        # plus layout plumbing is all dispatch overhead; let XLA fuse it.
        # bmm(bmm(x2^T, x1^T), x3^T) == (x3 @ x1 @ x2)^T
        return jnp.swapaxes(jnp.matmul(x3, jnp.matmul(x1, x2)), 1, 2)

    if D == 2:
        return _pallas_2x2(x1, x2, x3)
    return _pallas_general(x1, x2, x3)


if __name__ == "__main__":
    key = jax.random.PRNGKey(0)
    k1, k2, k3 = jax.random.split(key, 3)

    def reference(a, b, c):
        # Literal translation of the PyTorch module.
        return jnp.matmul(
            jnp.matmul(jnp.transpose(b, (0, 2, 1)), jnp.transpose(a, (0, 2, 1))),
            jnp.transpose(c, (0, 2, 1)))

    # 1) The module's actual shape (1, 2, 2) -> jnp fast path.
    x1 = jax.random.normal(k1, (1, 2, 2), jnp.float32)
    x2 = jax.random.normal(k2, (1, 2, 2), jnp.float32)
    x3 = jax.random.normal(k3, (1, 2, 2), jnp.float32)
    out = permute_matmul_fusion(x1, x2, x3)
    jax.block_until_ready(out)
    assert jnp.allclose(out, reference(x1, x2, x3), atol=1e-5, rtol=1e-5)

    # 2) Exercise the lane-interleaved VPU kernel (D == 2, padding path).
    B = 1000
    x1 = jax.random.normal(k1, (B, 2, 2), jnp.float32)
    x2 = jax.random.normal(k2, (B, 2, 2), jnp.float32)
    x3 = jax.random.normal(k3, (B, 2, 2), jnp.float32)
    out = permute_matmul_fusion(x1, x2, x3, force_pallas=True)
    jax.block_until_ready(out)
    assert jnp.allclose(out, reference(x1, x2, x3), atol=1e-4, rtol=1e-4)

    # 3) Exercise the batched MXU path (D != 2).
    B, D = 16, 8
    x1 = jax.random.normal(k1, (B, D, D), jnp.float32)
    x2 = jax.random.normal(k2, (B, D, D), jnp.float32)
    x3 = jax.random.normal(k3, (B, D, D), jnp.float32)
    out = permute_matmul_fusion(x1, x2, x3, force_pallas=True)
    jax.block_until_ready(out)
    assert jnp.allclose(out, reference(x1, x2, x3), atol=1e-4, rtol=1e-4)

    print("KERNEL_OK")
</pallas_src>

<mosaic_0001>
module attributes {stable_mosaic.version = 11 : i64} {
  func.func @_tiny_2x2_kernel(%arg0: i32, %arg1: memref<32x128xf32, #tpu.memory_space<vmem>>, %arg2: memref<32x128xf32, #tpu.memory_space<vmem>>, %arg3: memref<32x128xf32, #tpu.memory_space<vmem>>, %arg4: memref<32x128xf32, #tpu.memory_space<vmem>>) attributes {dimension_semantics = [#tpu.dimension_semantics<parallel>], iteration_bounds = array<i64: 1>, scalar_prefetch = 0 : i64, scratch_operands = 0 : i64, tpu.core_type = #tpu.core_type<tc>, window_params = [{transform_indices = @transform_0, window_bounds = array<i64: 32, 128>}, {transform_indices = @transform_1, window_bounds = array<i64: 32, 128>}, {transform_indices = @transform_2, window_bounds = array<i64: 32, 128>}, {transform_indices = @transform_3, window_bounds = array<i64: 32, 128>}]} {
    %c0 = arith.constant 0 : index
    %c0_0 = arith.constant 0 : index
    %0 = vector.load %arg1[%c0, %c0_0] : memref<32x128xf32, #tpu.memory_space<vmem>>, vector<32x128xf32>
    %c0_1 = arith.constant 0 : index
    %c0_2 = arith.constant 0 : index
    %1 = vector.load %arg2[%c0_1, %c0_2] : memref<32x128xf32, #tpu.memory_space<vmem>>, vector<32x128xf32>
    %c0_3 = arith.constant 0 : index
    %c0_4 = arith.constant 0 : index
    %2 = vector.load %arg3[%c0_3, %c0_4] : memref<32x128xf32, #tpu.memory_space<vmem>>, vector<32x128xf32>
    %3 = tpu.iota {dimensions = array<i32: 1>} : vector<32x128xi32>
    %c4_i32 = arith.constant 4 : i32
    %c0_i32 = arith.constant 0 : i32
    %4 = arith.cmpi eq, %c4_i32, %c0_i32 : i32
    %c1_i32 = arith.constant 1 : i32
    %5 = arith.select %4, %c1_i32, %c4_i32 : i32
    %6 = vector.broadcast %5 : i32 to vector<32x128xi32>
    %7 = arith.remsi %3, %6 : vector<32x128xi32>
    %c0_i32_5 = arith.constant 0 : i32
    %8 = vector.broadcast %c0_i32_5 : i32 to vector<32x128xi32>
    %9 = arith.cmpi ne, %7, %8 : vector<32x128xi32>
    %c0_i32_6 = arith.constant 0 : i32
    %10 = vector.broadcast %c0_i32_6 : i32 to vector<32x128xi32>
    %11 = arith.cmpi slt, %7, %10 : vector<32x128xi32>
    %c0_i32_7 = arith.constant 0 : i32
    %12 = arith.cmpi slt, %5, %c0_i32_7 : i32
    %13 = vector.broadcast %12 : i1 to vector<32x128xi1>
    %14 = vector.broadcast %13 : vector<32x128xi1> to vector<32x128xi1>
    %15 = arith.xori %11, %14 : vector<32x128xi1>
    %16 = arith.andi %15, %9 : vector<32x128xi1>
    %17 = vector.broadcast %5 : i32 to vector<32x128xi32>
    %18 = arith.addi %7, %17 : vector<32x128xi32>
    %19 = arith.select %16, %18, %7 : vector<32x128xi1>, vector<32x128xi32>
    %c1_i32_8 = arith.constant 1 : i32
    %20 = vector.broadcast %c1_i32_8 : i32 to vector<32x128xi32>
    %21 = arith.andi %19, %20 : vector<32x128xi32>
    %c0_i32_9 = arith.constant 0 : i32
    %22 = vector.broadcast %c0_i32_9 : i32 to vector<32x128xi32>
    %23 = arith.cmpi eq, %21, %22 : vector<32x128xi32>
    %c2_i32 = arith.constant 2 : i32
    %24 = vector.broadcast %c2_i32 : i32 to vector<32x128xi32>
    %25 = arith.cmpi slt, %19, %24 : vector<32x128xi32>
    %c1_i32_10 = arith.constant 1 : i32
    %26 = tpu.dynamic_rotate %0 by %c1_i32_10 dim 1 : vector<32x128xf32>, i32 -> vector<32x128xf32>
    %27 = arith.select %23, %0, %26 : vector<32x128xi1>, vector<32x128xf32>
    %c127_i32 = arith.constant 127 : i32
    %28 = tpu.dynamic_rotate %0 by %c127_i32 dim 1 : vector<32x128xf32>, i32 -> vector<32x128xf32>
    %29 = arith.select %23, %28, %0 : vector<32x128xi1>, vector<32x128xf32>
    %c2_i32_11 = arith.constant 2 : i32
    %30 = tpu.dynamic_rotate %1 by %c2_i32_11 dim 1 : vector<32x128xf32>, i32 -> vector<32x128xf32>
    %31 = arith.select %25, %1, %30 : vector<32x128xi1>, vector<32x128xf32>
    %c126_i32 = arith.constant 126 : i32
    %32 = tpu.dynamic_rotate %1 by %c126_i32 dim 1 : vector<32x128xf32>, i32 -> vector<32x128xf32>
    %33 = arith.select %25, %32, %1 : vector<32x128xi1>, vector<32x128xf32>
    %34 = arith.mulf %27, %31 : vector<32x128xf32>
    %35 = arith.mulf %29, %33 : vector<32x128xf32>
    %36 = arith.addf %34, %35 : vector<32x128xf32>
    %c1_i32_12 = arith.constant 1 : i32
    %37 = tpu.dynamic_rotate %2 by %c1_i32_12 dim 1 : vector<32x128xf32>, i32 -> vector<32x128xf32>
    %38 = arith.select %23, %2, %37 : vector<32x128xi1>, vector<32x128xf32>
    %c127_i32_13 = arith.constant 127 : i32
    %39 = tpu.dynamic_rotate %2 by %c127_i32_13 dim 1 : vector<32x128xf32>, i32 -> vector<32x128xf32>
    %40 = arith.select %23, %39, %2 : vector<32x128xi1>, vector<32x128xf32>
    %c2_i32_14 = arith.constant 2 : i32
    %41 = tpu.dynamic_rotate %36 by %c2_i32_14 dim 1 : vector<32x128xf32>, i32 -> vector<32x128xf32>
    %42 = arith.select %25, %36, %41 : vector<32x128xi1>, vector<32x128xf32>
    %c126_i32_15 = arith.constant 126 : i32
    %43 = tpu.dynamic_rotate %36 by %c126_i32_15 dim 1 : vector<32x128xf32>, i32 -> vector<32x128xf32>
    %44 = arith.select %25, %43, %36 : vector<32x128xi1>, vector<32x128xf32>
    %45 = arith.mulf %38, %42 : vector<32x128xf32>
    %46 = arith.mulf %40, %44 : vector<32x128xf32>
    %47 = arith.addf %45, %46 : vector<32x128xf32>
    %c1_i32_16 = arith.constant 1 : i32
    %48 = vector.broadcast %c1_i32_16 : i32 to vector<32x128xi32>
    %49 = arith.cmpi eq, %19, %48 : vector<32x128xi32>
    %c127_i32_17 = arith.constant 127 : i32
    %50 = tpu.dynamic_rotate %47 by %c127_i32_17 dim 1 : vector<32x128xf32>, i32 -> vector<32x128xf32>
    %c2_i32_18 = arith.constant 2 : i32
    %51 = vector.broadcast %c2_i32_18 : i32 to vector<32x128xi32>
    %52 = arith.cmpi eq, %19, %51 : vector<32x128xi32>
    %c1_i32_19 = arith.constant 1 : i32
    %53 = tpu.dynamic_rotate %47 by %c1_i32_19 dim 1 : vector<32x128xf32>, i32 -> vector<32x128xf32>
    %54 = arith.select %52, %53, %47 : vector<32x128xi1>, vector<32x128xf32>
    %55 = arith.select %49, %50, %54 : vector<32x128xi1>, vector<32x128xf32>
    %c0_20 = arith.constant 0 : index
    %c0_21 = arith.constant 0 : index
    %56 = vector.load %arg4[%c0_20, %c0_21] : memref<32x128xf32, #tpu.memory_space<vmem>>, vector<32x128xf32>
    tpu.vector_store %arg4[%c0_20, %c0_21], %55 {strides = array<i32>} : memref<32x128xf32, #tpu.memory_space<vmem>>, vector<32x128xf32>,
    return
  }
  func.func @transform_0(%arg0: i32) -> (i32, i32) {
    %c0_i32 = arith.constant 0 : i32
    %c0_i32_0 = arith.constant 0 : i32
    return %arg0, %c0_i32 : i32, i32
  }
  func.func @transform_1(%arg0: i32) -> (i32, i32) {
    %c0_i32 = arith.constant 0 : i32
    %c0_i32_0 = arith.constant 0 : i32
    return %arg0, %c0_i32 : i32, i32
  }
  func.func @transform_2(%arg0: i32) -> (i32, i32) {
    %c0_i32 = arith.constant 0 : i32
    %c0_i32_0 = arith.constant 0 : i32
    return %arg0, %c0_i32 : i32, i32
  }
  func.func @transform_3(%arg0: i32) -> (i32, i32) {
    %c0_i32 = arith.constant 0 : i32
    %c0_i32_0 = arith.constant 0 : i32
    return %arg0, %c0_i32 : i32, i32
  }
}

</mosaic_0001>

<bundles_post_ra>
// kernel: tpu_custom_call.1
= control target key start
LH: loop header
LB: loop body
LE: loop exit
PB: predicated region body
PF: predicated region fallthrough
CT: control target
= control target key end

     0   :  { %8 = vsyncpa [#allocation3], 0  ;;  %s636_s0 = inlined_call_operand.hbm [shape: f32[32,128], index: 0, kind: input, shape index: {}]   ;;  %s637_s1 = inlined_call_operand.hbm [shape: f32[32,128], index: 1, kind: input, shape index: {}]   ;;  %s638_s2 = inlined_call_operand.hbm [shape: f32[32,128], index: 2, kind: input, shape index: {}]   ;;  %s639_s3 = inlined_call_operand.hbm [shape: f32[32,128], index: 3, kind: output, shape index: {}]  }
   0x1   :  { %9 = vsyncpa [#allocation6], 0 }
   0x2   :  { %10 = vsyncpa [#allocation4], 0  ;;  %s357_s12 = smov [#allocation5]   ;;  %s358_s14 = smov [#allocation2]  }
   0x3   :  { %s28_s13 = sshll.u32 %s357_s12, 4  ;;  %s16_s15 = sshll.u32 %s358_s14, 4  ;;  %s29_s13 = int_to_ptr.vmem [resolvable:$true] %s28_s13  ;;  %s387_s15 = int_to_ptr.vmem [resolvable:$true] %s16_s15 }
   0x4   :  { %s263_s18 = scalar_lea.hbm %s637_s1, 512 }
   0x5   :  { %p264_p0 = scmp.ne.s32.totalorder %s637_s1, %s263_s18  ;;  %p267_p1 = scmp.lt.u32.totalorder %s263_s18, %s637_s1 }
   0x7   :  { %p269_p2 = pnand %p267_p1, %p264_p0 }
   0x9   :  { %272 = shalt.err (!%p269_p2)
}
   0xa   :  { %s273_s23 = scalar_lea.vmem %s29_s13, 512  ;;  %p278_p4 = scmp.lt.s32.totalorder %s29_s13, %s29_s13 }
   0xb   :  { %p274_p3 = scmp.ne.s32.totalorder %s29_s13, %s273_s23  ;;  %p279_p5 = scmp.lt.s32.totalorder %s273_s23, %s273_s23 }
   0xd   :  { %p280_p6 = por %p279_p5, %p278_p4 }
   0xf   :  { %p281_p7 = pnand %p280_p6, %p274_p3 }
  0x11   :  { %284 = shalt.err (!%p281_p7)
}
  0x12   :  { %s359_s24 = smov 128   ;;  %s360_s25 = smov 8  }
  0x13   :  { %34 = dma.hbm_to_vmem [thread:$0]  %s637_s1, 512, %s29_s13, [#allocation6], %s359_s24, %s359_s24, %s360_s25  }
  0x14   :  { %s285_s30 = scalar_lea.hbm %s636_s0, 512 }
  0x15   :  { %p286_p8 = scmp.ne.s32.totalorder %s636_s0, %s285_s30  ;;  %p289_p9 = scmp.lt.u32.totalorder %s285_s30, %s636_s0 }
  0x17   :  { %p291_p10 = pnand %p289_p9, %p286_p8 }
  0x19   :  { %294 = shalt.err (!%p291_p10)
}
  0x1a   :  { %s295_s8 = scalar_lea.vmem %s387_s15, 512  ;;  %p300_p12 = scmp.lt.s32.totalorder %s387_s15, %s387_s15 }
  0x1b   :  { %p296_p11 = scmp.ne.s32.totalorder %s387_s15, %s295_s8  ;;  %p301_p13 = scmp.lt.s32.totalorder %s295_s8, %s295_s8 }
  0x1d   :  { %p302_p0 = por %p301_p13, %p300_p12 }
  0x1f   :  { %p303_p1 = pnand %p302_p0, %p296_p11 }
  0x21   :  { %306 = shalt.err (!%p303_p1)
}
  0x22   :  { %22 = dma.hbm_to_vmem [thread:$0]  %s636_s0, 512, %s387_s15, [#allocation3], %s359_s24, %s359_s24, %s360_s25  }
  0x23   :  { %s361_s10 = smov [#allocation7]   ;;  %s307_s14 = scalar_lea.hbm %s638_s2, 512 }
  0x24   :  { %s40_s11 = sshll.u32 %s361_s10, 4  ;;  %p308_p2 = scmp.ne.s32.totalorder %s638_s2, %s307_s14  ;;  %s41_s11 = int_to_ptr.vmem [resolvable:$true] %s40_s11 }
  0x25   :  { %p311_p3 = scmp.lt.u32.totalorder %s307_s14, %s638_s2 }
  0x27   :  { %p313_p4 = pnand %p311_p3, %p308_p2 }
  0x29   :  { %316 = shalt.err (!%p313_p4)
}
  0x2a   :  { %s317_s20 = scalar_lea.vmem %s41_s11, 512  ;;  %p322_p6 = scmp.lt.s32.totalorder %s41_s11, %s41_s11 }
  0x2b   :  { %p318_p5 = scmp.ne.s32.totalorder %s41_s11, %s317_s20  ;;  %p323_p7 = scmp.lt.s32.totalorder %s317_s20, %s317_s20 }
  0x2d   :  { %p324_p8 = por %p323_p7, %p322_p6 }
  0x2f   :  { %p325_p9 = pnand %p324_p8, %p318_p5 }
  0x31   :  { %328 = shalt.err (!%p325_p9)
}
  0x32   :  { %46 = dma.hbm_to_vmem [thread:$0]  %s638_s2, 512, %s41_s11, [#allocation6], %s359_s24, %s359_s24, %s360_s25  }
  0x33   :  { %351 = dma.done.wait [#allocation3], 512  }
  0x34   :  { %352 = vsyncadd [#allocation3], 4294966784 }
  0x35   :  { %353 = dma.done.wait [#allocation6], 1024  }
  0x36   :  { %354 = vsyncadd [#allocation6], 4294966272  ;;  %v439_v0 = vld [vmem:[#allocation2 + $0x10] sm:$0xff]  ;;  %v441_v1 = vld [vmem:[#allocation2] sm:$0xff]  ;;  %s362_s21 = smov 1   ;;  %s363_s2 = smov 127   ;;  %v68_v16 = vlaneseq }
  0x37   :  { %89 = vrot.lane.b32.xlu1 %v439_v0, %s362_s21  ;;  %85 = vrot.lane.b32.xlu0 %v441_v1, %s362_s21  ;;  %v447_v2 = vld [vmem:[#allocation2 + $0x18] sm:$0xff]  ;;  %v449_v3 = vld [vmem:[#allocation2 + $0x8] sm:$0xff]  ;;  %v60_v5 = vld [vmem:[#allocation5] sm:$0xff]  ;;  %s364_s22 = smov 2   ;;  %s365_s23 = smov 126  }
  0x38   :  { %v61_v4 = vld [vmem:[#allocation5 + $0x8] sm:$0xff]  ;;  %v465_v6 = vld [vmem:[#allocation5 + $0x18] sm:$0xff]  ;;  %v467_v7 = vld [vmem:[#allocation5 + $0x10] sm:$0xff]  ;;  %v69_v19 = vand.u32 127, %v68_v16  ;;  %s366_s26 = smov [#allocation8]  }
  0x39   :  { %v479_v8 = vld [vmem:[#allocation7 + $0x8] sm:$0xff]  ;;  %v481_v9 = vld [vmem:[#allocation7] sm:$0xff]  ;;  %v487_v10 = vld [vmem:[#allocation7 + $0x18] sm:$0xff]  ;;  %s240_s27 = sshll.u32 %s366_s26, 4  ;;  %s241_s27 = int_to_ptr.vmem [resolvable:$true] %s240_s27 }
  0x3a   :  { %v489_v11 = vld [vmem:[#allocation7 + $0x10] sm:$0xff]  ;;  %v503_v22 = vand.u32 3, %v69_v19  ;;  %s329_s28 = scalar_lea.vmem %s241_s27, 512  ;;  %p334_p11 = scmp.lt.s32.totalorder %s241_s27, %s241_s27 }
  0x3b   :  { %91 = vrot.lane.b32.xlu1 %v447_v2, %s362_s21  ;;  %87 = vrot.lane.b32.xlu0 %v449_v3, %s362_s21  ;;  %p330_p10 = scmp.ne.s32.totalorder %s241_s27, %s329_s28  ;;  %p335_p12 = scmp.lt.s32.totalorder %s329_s28, %s329_s28 }
  0x3c   :  { %v82_v25 = vand.u32 1, %v503_v22  ;;  %vm84_vm0 = vcmp.lt.s32.totalorder %v503_v22, 2  ;;  %vm214_vm2 = vcmp.eq.s32.totalorder %v503_v22, 2  ;;  %vm205_vm3 = vcmp.eq.s32.totalorder %v503_v22, 1 }
  0x3d   :  { %p336_p13 = por %p335_p12, %p334_p11 }
  0x3e   :  { %vm507_vm1 = vcmp.eq.s32.totalorder %v82_v25, 0 }
  0x3f   :  { %99 = vrot.lane.b32.xlu1 %v449_v3, %s363_s2  ;;  %97 = vrot.lane.b32.xlu0 %v441_v1, %s363_s2  ;;  %p337_p0 = pnand %p336_p13, %p330_p10 }
  0x43   :  { %103 = vrot.lane.b32.xlu1 %v447_v2, %s363_s2  ;;  %101 = vrot.lane.b32.xlu0 %v439_v0, %s363_s2 }
  0x47   :  { %111 = vrot.lane.b32.xlu1 %v61_v4, %s364_s22  ;;  %109 = vrot.lane.b32.xlu0 %v60_v5, %s364_s22 }
  0x4b   :  { %115 = vrot.lane.b32.xlu1 %v465_v6, %s364_s22  ;;  %113 = vrot.lane.b32.xlu0 %v467_v7, %s364_s22 }
  0x4f   :  { %123 = vrot.lane.b32.xlu1 %v61_v4, %s365_s23  ;;  %121 = vrot.lane.b32.xlu0 %v60_v5, %s365_s23 }
  0x53   :  { %127 = vrot.lane.b32.xlu1 %v465_v6, %s365_s23  ;;  %125 = vrot.lane.b32.xlu0 %v467_v7, %s365_s23 }
  0x57   :  { %147 = vrot.lane.b32.xlu1 %v479_v8, %s362_s21  ;;  %145 = vrot.lane.b32.xlu0 %v481_v9, %s362_s21 }
  0x5b   :  { %151 = vrot.lane.b32.xlu1 %v487_v10, %s362_s21  ;;  %149 = vrot.lane.b32.xlu0 %v489_v11, %s362_s21 }
  0x5f   :  { %159 = vrot.lane.b32.xlu1 %v479_v8, %s363_s2  ;;  %157 = vrot.lane.b32.xlu0 %v481_v9, %s363_s2 }
  0x63   :  { %163 = vrot.lane.b32.xlu1 %v487_v10, %s363_s2  ;;  %161 = vrot.lane.b32.xlu0 %v489_v11, %s363_s2 }
  0xa9   :  { %v90_v12 = vpop.permute.xlu1 %89  ;;  %v86_v13 = vpop.permute.xlu0 %85 }
  0xaa   :  { %v93_v31 = vsel %vm507_vm1, %v441_v1, %v86_v13  ;;  %v95_v44 = vsel %vm507_vm1, %v439_v0, %v90_v12 }
  0xad   :  { %v92_v14 = vpop.permute.xlu1 %91  ;;  %v88_v15 = vpop.permute.xlu0 %87 }
  0xae   :  { %v94_v32 = vsel %vm507_vm1, %v449_v3, %v88_v15  ;;  %v96_v46 = vsel %vm507_vm1, %v447_v2, %v92_v14 }
  0xb1   :  { %v100_v17 = vpop.permute.xlu1 %99  ;;  %v98_v18 = vpop.permute.xlu0 %97 }
  0xb2   :  { %v106_v33 = vsel %vm507_vm1, %v100_v17, %v449_v3  ;;  %v105_v36 = vsel %vm507_vm1, %v98_v18, %v441_v1 }
  0xb5   :  { %v104_v20 = vpop.permute.xlu1 %103  ;;  %v102_v21 = vpop.permute.xlu0 %101 }
  0xb6   :  { %v108_v47 = vsel %vm507_vm1, %v104_v20, %v447_v2  ;;  %v107_v52 = vsel %vm507_vm1, %v102_v21, %v439_v0 }
  0xb9   :  { %v112_v23 = vpop.permute.xlu1 %111  ;;  %v110_v24 = vpop.permute.xlu0 %109 }
  0xba   :  { %v118_v29 = vsel %vm84_vm0, %v61_v4, %v112_v23  ;;  %v117_v30 = vsel %vm84_vm0, %v60_v5, %v110_v24 }
  0xbb   :  { %v134_v37 = vmul.f32 %v118_v29, %v94_v32  ;;  %v133_v40 = vmul.f32 %v117_v30, %v93_v31 }
  0xbd   :  { %v116_v26 = vpop.permute.xlu1 %115  ;;  %v114_v27 = vpop.permute.xlu0 %113 }
  0xbe   :  { %v120_v41 = vsel %vm84_vm0, %v465_v6, %v116_v26  ;;  %v119_v45 = vsel %vm84_vm0, %v467_v7, %v114_v27 }
  0xbf   :  { %v136_v53 = vmul.f32 %v120_v41, %v96_v46  ;;  %v135_v56 = vmul.f32 %v119_v45, %v95_v44 }
  0xc1   :  { %v124_v34 = vpop.permute.xlu1 %123  ;;  %v122_v35 = vpop.permute.xlu0 %121 }
  0xc2   :  { %v130_v38 = vsel %vm84_vm0, %v124_v34, %v61_v4  ;;  %v129_v39 = vsel %vm84_vm0, %v122_v35, %v60_v5 }
  0xc3   :  { %v138_v42 = vmul.f32 %v130_v38, %v106_v33  ;;  %v137_v43 = vmul.f32 %v129_v39, %v105_v36 }
  0xc5   :  { %v142_v48 = vadd.f32 %v138_v42, %v134_v37  ;;  %v141_v49 = vadd.f32 %v137_v43, %v133_v40  ;;  %v128_v50 = vpop.permute.xlu1 %127  ;;  %v126_v51 = vpop.permute.xlu0 %125 }
  0xc6   :  { %v132_v54 = vsel %vm84_vm0, %v128_v50, %v465_v6  ;;  %v131_v55 = vsel %vm84_vm0, %v126_v51, %v467_v7 }
  0xc7   :  { %v140_v57 = vmul.f32 %v132_v54, %v108_v47  ;;  %v139_v58 = vmul.f32 %v131_v55, %v107_v52  ;;  %171 = vrot.lane.b32.xlu1 %v142_v48, %s364_s22  ;;  %169 = vrot.lane.b32.xlu0 %v141_v49, %s364_s22 }
  0xc9   :  { %v144_v59 = vadd.f32 %v140_v57, %v136_v53  ;;  %v143_v60 = vadd.f32 %v139_v58, %v135_v56  ;;  %v148_v61 = vpop.permute.xlu1 %147  ;;  %v146_v62 = vpop.permute.xlu0 %145 }
  0xca   :  { %v154_v15 = vsel %vm507_vm1, %v479_v8, %v148_v61  ;;  %v153_v16 = vsel %vm507_vm1, %v481_v9, %v146_v62 }
  0xcb   :  { %175 = vrot.lane.b32.xlu1 %v144_v59, %s364_s22  ;;  %173 = vrot.lane.b32.xlu0 %v143_v60, %s364_s22 }
  0xcd   :  { %v152_v63 = vpop.permute.xlu1 %151  ;;  %v150_v0 = vpop.permute.xlu0 %149 }
  0xce   :  { %v155_v30 = vsel %vm507_vm1, %v489_v11, %v150_v0 }
  0xcf   :  { %183 = vrot.lane.b32.xlu1 %v142_v48, %s365_s23  ;;  %181 = vrot.lane.b32.xlu0 %v141_v49, %s365_s23 }
  0xd1   :  { %v160_v1 = vpop.permute.xlu1 %159  ;;  %v158_v2 = vpop.permute.xlu0 %157 }
  0xd2   :  { %v166_v17 = vsel %vm507_vm1, %v160_v1, %v479_v8  ;;  %v165_v20 = vsel %vm507_vm1, %v158_v2, %v481_v9  ;;  %v156_v8 = vsel %vm507_vm1, %v487_v10, %v152_v63 }
  0xd3   :  { %187 = vrot.lane.b32.xlu1 %v144_v59, %s365_s23  ;;  %185 = vrot.lane.b32.xlu0 %v143_v60, %s365_s23 }
  0xd5   :  { %v164_v3 = vpop.permute.xlu1 %163  ;;  %v162_v4 = vpop.permute.xlu0 %161 }
  0xd6   :  { %v168_v31 = vsel %vm507_vm1, %v164_v3, %v487_v10  ;;  %v167_v36 = vsel %vm507_vm1, %v162_v4, %v489_v11 }
 0x139   :  { %v172_v5 = vpop.permute.xlu1 %171  ;;  %v170_v6 = vpop.permute.xlu0 %169 }
 0x13a   :  { %v178_v13 = vsel %vm84_vm0, %v142_v48, %v172_v5  ;;  %v177_v14 = vsel %vm84_vm0, %v141_v49, %v170_v6 }
 0x13b   :  { %v194_v21 = vmul.f32 %v178_v13, %v154_v15  ;;  %v193_v25 = vmul.f32 %v177_v14, %v153_v16 }
 0x13d   :  { %v176_v7 = vpop.permute.xlu1 %175  ;;  %v174_v12 = vpop.permute.xlu0 %173 }
 0x13e   :  { %v180_v26 = vsel %vm84_vm0, %v144_v59, %v176_v7  ;;  %v179_v9 = vsel %vm84_vm0, %v143_v60, %v174_v12 }
 0x13f   :  { %v196_v37 = vmul.f32 %v180_v26, %v156_v8  ;;  %v195_v40 = vmul.f32 %v179_v9, %v155_v30 }
 0x141   :  { %v184_v18 = vpop.permute.xlu1 %183  ;;  %v182_v19 = vpop.permute.xlu0 %181 }
 0x142   :  { %v190_v23 = vsel %vm84_vm0, %v184_v18, %v142_v48  ;;  %v189_v24 = vsel %vm84_vm0, %v182_v19, %v141_v49 }
 0x143   :  { %v198_v27 = vmul.f32 %v190_v23, %v166_v17  ;;  %v197_v29 = vmul.f32 %v189_v24, %v165_v20 }
 0x145   :  { %v188_v32 = vpop.permute.xlu1 %187  ;;  %v186_v33 = vpop.permute.xlu0 %185  ;;  %v202_v34 = vadd.f32 %v198_v27, %v194_v21  ;;  %v201_v35 = vadd.f32 %v197_v29, %v193_v25 }
 0x146   :  { %v192_v38 = vsel %vm84_vm0, %v188_v32, %v144_v59  ;;  %v191_v39 = vsel %vm84_vm0, %v186_v33, %v143_v60 }
 0x147   :  { %v200_v41 = vmul.f32 %v192_v38, %v168_v31  ;;  %v199_v42 = vmul.f32 %v191_v39, %v167_v36  ;;  %217 = vrot.lane.b32.xlu1 %v202_v34, %s362_s21  ;;  %215 = vrot.lane.b32.xlu0 %v201_v35, %s362_s21 }
 0x149   :  { %v204_v10 = vadd.f32 %v200_v41, %v196_v37  ;;  %v203_v43 = vadd.f32 %v199_v42, %v195_v40 }
 0x14b   :  { %221 = vrot.lane.b32.xlu1 %v204_v10, %s362_s21  ;;  %219 = vrot.lane.b32.xlu0 %v203_v43, %s362_s21 }
 0x14f   :  { %208 = vrot.lane.b32.xlu1 %v202_v34, %s363_s2  ;;  %206 = vrot.lane.b32.xlu0 %v201_v35, %s363_s2 }
 0x153   :  { %212 = vrot.lane.b32.xlu1 %v204_v10, %s363_s2  ;;  %210 = vrot.lane.b32.xlu0 %v203_v43, %s363_s2 }
 0x1b9   :  { %v218_v11 = vpop.permute.xlu1 %217  ;;  %v216_v28 = vpop.permute.xlu0 %215 }
 0x1ba   :  { %v224_v46 = vsel %vm214_vm2, %v218_v11, %v202_v34  ;;  %v223_v47 = vsel %vm214_vm2, %v216_v28, %v201_v35 }
 0x1bd   :  { %v222_v44 = vpop.permute.xlu1 %221  ;;  %v220_v45 = vpop.permute.xlu0 %219 }
 0x1be   :  { %v226_v52 = vsel %vm214_vm2, %v222_v44, %v204_v10  ;;  %v225_v53 = vsel %vm214_vm2, %v220_v45, %v203_v43 }
 0x1c1   :  { %v209_v48 = vpop.permute.xlu1 %208  ;;  %v207_v49 = vpop.permute.xlu0 %206 }
 0x1c2   :  { %v228_v50 = vsel %vm205_vm3, %v209_v48, %v224_v46  ;;  %v227_v51 = vsel %vm205_vm3, %v207_v49, %v223_v47 }
 0x1c3   :  { %232 = vst [vmem:[#allocation8 + $0x8] sm:$0xff] %v228_v50  ;;  %231 = vst [vmem:[#allocation8] sm:$0xff] %v227_v51 }
 0x1c5   :  { %v213_v54 = vpop.permute.xlu1 %212  ;;  %v211_v55 = vpop.permute.xlu0 %210 }
 0x1c6   :  { %v230_v56 = vsel %vm205_vm3, %v213_v54, %v226_v52  ;;  %v229_v57 = vsel %vm205_vm3, %v211_v55, %v225_v53 }
 0x1c7   :  { %234 = vst [vmem:[#allocation8 + $0x18] sm:$0xff] %v230_v56  ;;  %233 = vst [vmem:[#allocation8 + $0x10] sm:$0xff] %v229_v57 }
 0x1c8   :  { %340 = shalt.err (!%p337_p0)
}
 0x1c9   :  { %s341_s4 = scalar_lea.hbm %s639_s3, 512 }
 0x1ca   :  { %p342_p1 = scmp.ne.s32.totalorder %s639_s3, %s341_s4  ;;  %p345_p2 = scmp.lt.u32.totalorder %s341_s4, %s639_s3 }
 0x1cc   :  { %p347_p3 = pnand %p345_p2, %p342_p1 }
 0x1ce   :  { %350 = shalt.err (!%p347_p3)
}
 0x1cf   :  { %246 = dma.vmem_to_hbm [thread:$0]  %s241_s27, 512, %s639_s3, [#allocation4], %s359_s24, %s359_s24, %s360_s25  }
 0x1d0   :  { %355 = dma.done.wait [#allocation4], 512  }
 0x1d1   :  { %356 = vsyncadd [#allocation4], 4294966784 }
 0x1d2   :  { %250 = vsyncpa [#allocation3], 1 }
 0x1d3   :  { %251 = vsyncpa [#allocation6], 1 }
 0x1d4   :  { %252 = vsyncpa [#allocation4], 1 }

</bundles_post_ra>
